<compile_context>
chip_gen: v6e
topology: v6e:2x2x1
jax: 0.10.0
libtpu: 0.0.40
codegen_flags: <defaults>
</compile_context>

<pallas_src>
import functools

import jax
import jax.numpy as jnp
from jax import lax
from jax.experimental import pallas as pl
from jax.experimental.pallas import tpu as pltpu

SPLIT = 12      # rows [:12] -> cross-entropy, rows [12:] -> MSE (from the PyTorch module)
LANES = 128
SUBLANES = 8


def _round_up(x, m):
    return ((x + m - 1) // m) * m


def _combined_loss_kernel(ce_inp_ref, ce_tgt_ref, mi_ref, mt_ref, out_ref,
                          acc_ref, *, tile_rows, inv_mse_den, inv_ce_den):
    p = pl.program_id(0)          # partition ("parallel" axis, v7x dual-core split)
    s = pl.program_id(1)          # streaming step within the partition

    @pl.when(s == 0)
    def _init():
        acc_ref[...] = jnp.zeros_like(acc_ref)

    # ---- MSE partial sums: (8,128) chunks, accumulator carried in vregs --------
    nchunks = tile_rows // SUBLANES

    def _body(k, acc):
        r0 = pl.multiple_of(k * SUBLANES, SUBLANES)
        d = (mi_ref[pl.ds(r0, SUBLANES), :] -
             mt_ref[pl.ds(r0, SUBLANES), :]).astype(jnp.float32)
        return acc + d * d

    partial = lax.fori_loop(0, nchunks, _body,
                            jnp.zeros((SUBLANES, LANES), jnp.float32),
                            unroll=min(8, nchunks))
    acc_ref[...] += partial

    # ---- finalize once per partition --------------------------------------------
    @pl.when(s == pl.num_programs(1) - 1)
    def _fin():
        mse_part = acc_ref[...] * jnp.float32(inv_mse_den)

        @pl.when(p == 0)
        def _with_ce():
            xs = ce_inp_ref[...].astype(jnp.float32)
            ts = ce_tgt_ref[...].astype(jnp.float32)
            z = xs - jnp.max(xs, axis=-1, keepdims=True)
            lse = jnp.log(jnp.sum(jnp.exp(z), axis=-1, keepdims=True))
            ce = -jnp.sum(ts * (z - lse)) * jnp.float32(inv_ce_den)
            sub = lax.broadcasted_iota(jnp.int32, (SUBLANES, LANES), 0)
            lane = lax.broadcasted_iota(jnp.int32, (SUBLANES, LANES), 1)
            onehot = jnp.logical_and(sub == 0, lane == 0)
            out_ref[...] = mse_part + jnp.where(onehot, ce, jnp.float32(0.0))

        @pl.when(p != 0)
        def _mse_only():
            out_ref[...] = mse_part


def combined_loss(inp, target, *, tile_rows=None, parts=None):
    """inp, target: (N, C) with N > 12 (soft-label targets). Returns f32 scalar."""
    n, c = inp.shape
    assert target.shape == inp.shape
    assert n > SPLIT, "need more than 12 rows so the MSE slice is non-empty"
    itemsize = jnp.dtype(inp.dtype).itemsize

    # Tiny cross-entropy operands (12 x C), passed as full-extent resident blocks.
    ce_inp, ce_tgt = inp[:SPLIT], target[:SPLIT]

    # Lane-dense MSE stream: flatten rows [12:], zero-pad, view as (rows, 128).
    m_rows = n - SPLIT
    n_mse = m_rows * c
    rows_needed = pl.cdiv(n_mse, LANES)

    if parts is None:
        # Two partitions whenever there is at least one (8,128) tile each, so
        # v7x can use both TensorCores; costs one extra grid step on v5e/v6e.
        parts = 2 if rows_needed >= 2 * SUBLANES else 1
    if tile_rows is None:
        # ~4 MiB per input block (dtype-aware); 2 inputs x 2 pipeline buffers
        # -> ~16 MiB, inside the 32 MiB scoped-VMEM limit on every generation.
        tile_rows = max(SUBLANES,
                        ((4 << 20) // (LANES * itemsize)) // SUBLANES * SUBLANES)
    tile_rows = max(SUBLANES, (tile_rows // SUBLANES) * SUBLANES)
    rows_per_part = _round_up(pl.cdiv(rows_needed, parts), SUBLANES)
    tile_rows = min(tile_rows, rows_per_part)
    steps = pl.cdiv(rows_per_part, tile_rows)
    rows_padded = parts * steps * tile_rows

    # Zero padding on both operands contributes (0-0)^2 = 0 -> no in-kernel mask.
    pad = rows_padded * LANES - n_mse
    mse_inp = jnp.pad(inp[SPLIT:].reshape(-1), (0, pad)).reshape(rows_padded, LANES)
    mse_tgt = jnp.pad(target[SPLIT:].reshape(-1), (0, pad)).reshape(rows_padded, LANES)
    # TODO(synk): when C is already a multiple of 128, a direct row-tiled path
    # would skip this wrapper-side repack copy; kept to a single code path here.

    kernel = functools.partial(
        _combined_loss_kernel,
        tile_rows=tile_rows,
        inv_mse_den=1.0 / float(n_mse),
        inv_ce_den=1.0 / float(SPLIT),
    )

    cost = pl.CostEstimate(
        flops=3 * rows_padded * LANES + 6 * SPLIT * c,
        transcendentals=2 * SPLIT * c,
        bytes_accessed=(2 * rows_padded * LANES * itemsize
                        + 2 * SPLIT * c * itemsize
                        + parts * SUBLANES * LANES * 4),
    )

    partials = pl.pallas_call(
        kernel,
        out_shape=jax.ShapeDtypeStruct((parts * SUBLANES, LANES), jnp.float32),
        grid_spec=pltpu.PrefetchScalarGridSpec(
            num_scalar_prefetch=0,
            grid=(parts, steps),
            in_specs=[
                pl.BlockSpec((SPLIT, c), lambda p, s: (0, 0)),
                pl.BlockSpec((SPLIT, c), lambda p, s: (0, 0)),
                pl.BlockSpec((tile_rows, LANES), lambda p, s: (p * steps + s, 0)),
                pl.BlockSpec((tile_rows, LANES), lambda p, s: (p * steps + s, 0)),
            ],
            out_specs=pl.BlockSpec((SUBLANES, LANES), lambda p, s: (p, 0)),
            scratch_shapes=[pltpu.VMEM((SUBLANES, LANES), jnp.float32)],
        ),
        compiler_params=pltpu.CompilerParams(
            dimension_semantics=("parallel", "arbitrary"),
            vmem_limit_bytes=32 * 1024 * 1024,
        ),
        cost_estimate=cost,
    )(ce_inp, ce_tgt, mse_inp, mse_tgt)

    # Final tiny combine: sum the (parts*8,128) per-part partials (CE is folded
    # into element [0,0] of partition 0; zero padding contributes nothing).
    return jnp.sum(partials)


def combined_loss_ref(inp, target):
    """Pure-JAX reference for a sanity check."""
    logp = jax.nn.log_softmax(inp[:SPLIT].astype(jnp.float32), axis=-1)
    cross = jnp.mean(-jnp.sum(target[:SPLIT].astype(jnp.float32) * logp, axis=-1))
    diff = (inp[SPLIT:] - target[SPLIT:]).astype(jnp.float32)
    return cross + jnp.mean(diff * diff)


if __name__ == "__main__":
    key = jax.random.PRNGKey(0)
    cases = [
        # (n, c, kwargs) — small shapes; kwargs force multi-step / dual-part paths.
        (16, 8, {}),                               # minimal: 1 partition, 1 step
        (64, 8, dict(tile_rows=8, parts=1)),       # explicit single partition
        (64, 128, dict(tile_rows=8, parts=2)),     # 2 partitions x 4 steps + padding
    ]
    for idx, (n, c, kwargs) in enumerate(cases):
        k1, k2 = jax.random.split(jax.random.fold_in(key, idx))
        inp = jax.random.normal(k1, (n, c), dtype=jnp.float32)
        # Soft-label targets (row-wise probability distributions) — the only
        # interpretation where MSE(inp[12:], target[12:]) is shape-consistent.
        target = jax.nn.softmax(
            jax.random.normal(k2, (n, c), dtype=jnp.float32), axis=-1)

        loss = combined_loss(inp, target, **kwargs)
        jax.block_until_ready(loss)

        ref = combined_loss_ref(inp, target)
        assert jnp.allclose(loss, ref, atol=1e-5, rtol=1e-5), (n, c, float(loss), float(ref))

    print("KERNEL_OK")
</pallas_src>

<mosaic_0001>
module attributes {stable_mosaic.version = 11 : i64} {
  func.func @_combined_loss_kernel(%arg0: i32, %arg1: i32, %arg2: memref<12x8xf32, #tpu.memory_space<vmem>>, %arg3: memref<12x8xf32, #tpu.memory_space<vmem>>, %arg4: memref<8x128xf32, #tpu.memory_space<vmem>>, %arg5: memref<8x128xf32, #tpu.memory_space<vmem>>, %arg6: memref<8x128xf32, #tpu.memory_space<vmem>>, %arg7: memref<8x128xf32, #tpu.memory_space<vmem>>) attributes {dimension_semantics = [#tpu.dimension_semantics<parallel>, #tpu.dimension_semantics<arbitrary>], iteration_bounds = array<i64: 1, 1>, scalar_prefetch = 0 : i64, scratch_operands = 1 : i64, tpu.core_type = #tpu.core_type<tc>, window_params = [{pipeline_mode = #tpu.pipeline_mode<synchronous>, transform_indices = @transform_0, window_bounds = array<i64: 12, 8>}, {pipeline_mode = #tpu.pipeline_mode<synchronous>, transform_indices = @transform_1, window_bounds = array<i64: 12, 8>}, {transform_indices = @transform_2, window_bounds = array<i64: 8, 128>}, {transform_indices = @transform_3, window_bounds = array<i64: 8, 128>}, {transform_indices = @transform_4, window_bounds = array<i64: 8, 128>}]} {
    %c0_i32 = arith.constant 0 : i32
    %0 = arith.cmpi eq, %arg1, %c0_i32 : i32
    %1 = arith.extui %0 : i1 to i32
    %c0_i32_0 = arith.constant 0 : i32
    %2 = arith.cmpi ne, %1, %c0_i32_0 : i32
    scf.if %2 {
      %cst_9 = arith.constant 0.000000e+00 : f32
      %19 = vector.broadcast %cst_9 : f32 to vector<8x128xf32>
      %c0_10 = arith.constant 0 : index
      %c0_11 = arith.constant 0 : index
      %20 = vector.load %arg7[%c0_10, %c0_11] : memref<8x128xf32, #tpu.memory_space<vmem>>, vector<8x128xf32>
      tpu.vector_store %arg7[%c0_10, %c0_11], %19 {strides = array<i32>} : memref<8x128xf32, #tpu.memory_space<vmem>>, vector<8x128xf32>,
    } else {
    }
    %cst = arith.constant 0.000000e+00 : f32
    %3 = vector.broadcast %cst : f32 to vector<8x128xf32>
    %c0_i32_1 = arith.constant 0 : i32
    %c8_i32 = arith.constant 8 : i32
    %4 = arith.muli %c0_i32_1, %c8_i32 : i32
    %5 = tpu.assume_multiple %4, 8 : i32
    %6 = arith.index_cast %5 : i32 to index
    %c0 = arith.constant 0 : index
    %7 = vector.load %arg4[%6, %c0] : memref<8x128xf32, #tpu.memory_space<vmem>>, vector<8x128xf32>
    %8 = arith.index_cast %5 : i32 to index
    %c0_2 = arith.constant 0 : index
    %9 = vector.load %arg5[%8, %c0_2] : memref<8x128xf32, #tpu.memory_space<vmem>>, vector<8x128xf32>
    %10 = arith.subf %7, %9 : vector<8x128xf32>
    %11 = arith.mulf %10, %10 : vector<8x128xf32>
    %12 = arith.addf %3, %11 : vector<8x128xf32>
    %c1_i32 = arith.constant 1 : i32
    %c0_3 = arith.constant 0 : index
    %c0_4 = arith.constant 0 : index
    %13 = vector.load %arg7[%c0_3, %c0_4] : memref<8x128xf32, #tpu.memory_space<vmem>>, vector<8x128xf32>
    %14 = arith.addf %13, %12 : vector<8x128xf32>
    %c0_5 = arith.constant 0 : index
    %c0_6 = arith.constant 0 : index
    %15 = vector.load %arg7[%c0_5, %c0_6] : memref<8x128xf32, #tpu.memory_space<vmem>>, vector<8x128xf32>
    tpu.vector_store %arg7[%c0_5, %c0_6], %14 {strides = array<i32>} : memref<8x128xf32, #tpu.memory_space<vmem>>, vector<8x128xf32>,
    %c0_i32_7 = arith.constant 0 : i32
    %16 = arith.cmpi eq, %arg1, %c0_i32_7 : i32
    %17 = arith.extui %16 : i1 to i32
    %c0_i32_8 = arith.constant 0 : i32
    %18 = arith.cmpi ne, %17, %c0_i32_8 : i32
    scf.if %18 {
      %c0_9 = arith.constant 0 : index
      %c0_10 = arith.constant 0 : index
      %19 = vector.load %arg7[%c0_9, %c0_10] : memref<8x128xf32, #tpu.memory_space<vmem>>, vector<8x128xf32>
      %cst_11 = arith.constant 3.125000e-02 : f32
      %20 = vector.broadcast %cst_11 : f32 to vector<8x128xf32>
      %21 = arith.mulf %19, %20 : vector<8x128xf32>
      %c0_i32_12 = arith.constant 0 : i32
      %22 = arith.cmpi eq, %arg0, %c0_i32_12 : i32
      %23 = arith.extui %22 : i1 to i32
      %c0_i32_13 = arith.constant 0 : i32
      %24 = arith.cmpi ne, %23, %c0_i32_13 : i32
      scf.if %24 {
        %c0_16 = arith.constant 0 : index
        %c0_17 = arith.constant 0 : index
        %28 = vector.load %arg2[%c0_16, %c0_17] : memref<12x8xf32, #tpu.memory_space<vmem>>, vector<12x8xf32>
        %c0_18 = arith.constant 0 : index
        %c0_19 = arith.constant 0 : index
        %29 = vector.load %arg3[%c0_18, %c0_19] : memref<12x8xf32, #tpu.memory_space<vmem>>, vector<12x8xf32>
        %cst_20 = arith.constant dense<0xFF800000> : vector<12xf32>
        %30 = vector.multi_reduction <maximumf>, %28, %cst_20 [1] : vector<12x8xf32> to vector<12xf32>
        %31 = vector.shape_cast %30 : vector<12xf32> to vector<12x1xf32>
        %32 = vector.broadcast %31 : vector<12x1xf32> to vector<12x8xf32>
        %33 = arith.subf %28, %32 : vector<12x8xf32>
        %34 = math.exp %33 : vector<12x8xf32>
        %cst_21 = arith.constant dense<0.000000e+00> : vector<12xf32>
        %35 = vector.multi_reduction <add>, %34, %cst_21 [1] : vector<12x8xf32> to vector<12xf32>
        %36 = vector.shape_cast %35 : vector<12xf32> to vector<12x1xf32>
        %37 = math.log %36 : vector<12x1xf32>
        %38 = vector.broadcast %37 : vector<12x1xf32> to vector<12x8xf32>
        %39 = arith.subf %33, %38 : vector<12x8xf32>
        %40 = arith.mulf %29, %39 : vector<12x8xf32>
        %41 = vector.shape_cast %40 : vector<12x8xf32> to vector<1x12x8xf32>
        %cst_22 = arith.constant dense<0.000000e+00> : vector<1xf32>
        %42 = vector.multi_reduction <add>, %41, %cst_22 [1, 2] : vector<1x12x8xf32> to vector<1xf32>
        %43 = vector.shape_cast %42 : vector<1xf32> to vector<1x1x1xf32>
        %44 = vector.extract %43[0, 0, 0] : f32 from vector<1x1x1xf32>
        %cst_23 = arith.constant 0.000000e+00 : f32
        %45 = arith.subf %cst_23, %44 : f32
        %cst_24 = arith.constant 0.0833333358 : f32
        %46 = arith.mulf %45, %cst_24 : f32
        %47 = tpu.iota {dimensions = array<i32: 0>} : vector<8x128xi32>
        %48 = tpu.iota {dimensions = array<i32: 1>} : vector<8x128xi32>
        %c0_i32_25 = arith.constant 0 : i32
        %49 = vector.broadcast %c0_i32_25 : i32 to vector<8x128xi32>
        %50 = arith.cmpi eq, %47, %49 : vector<8x128xi32>
        %c0_i32_26 = arith.constant 0 : i32
        %51 = vector.broadcast %c0_i32_26 : i32 to vector<8x128xi32>
        %52 = arith.cmpi eq, %48, %51 : vector<8x128xi32>
        %53 = arith.andi %50, %52 : vector<8x128xi1>
        %cst_27 = arith.constant 0.000000e+00 : f32
        %54 = vector.broadcast %46 : f32 to vector<8x128xf32>
        %55 = vector.broadcast %cst_27 : f32 to vector<8x128xf32>
        %56 = arith.select %53, %54, %55 : vector<8x128xi1>, vector<8x128xf32>
        %57 = arith.addf %21, %56 : vector<8x128xf32>
        %c0_28 = arith.constant 0 : index
        %c0_29 = arith.constant 0 : index
        %58 = vector.load %arg6[%c0_28, %c0_29] : memref<8x128xf32, #tpu.memory_space<vmem>>, vector<8x128xf32>
        tpu.vector_store %arg6[%c0_28, %c0_29], %57 {strides = array<i32>} : memref<8x128xf32, #tpu.memory_space<vmem>>, vector<8x128xf32>,
      } else {
      }
      %c0_i32_14 = arith.constant 0 : i32
      %25 = arith.cmpi ne, %arg0, %c0_i32_14 : i32
      %26 = arith.extui %25 : i1 to i32
      %c0_i32_15 = arith.constant 0 : i32
      %27 = arith.cmpi ne, %26, %c0_i32_15 : i32
      scf.if %27 {
        %c0_16 = arith.constant 0 : index
        %c0_17 = arith.constant 0 : index
        %28 = vector.load %arg6[%c0_16, %c0_17] : memref<8x128xf32, #tpu.memory_space<vmem>>, vector<8x128xf32>
        tpu.vector_store %arg6[%c0_16, %c0_17], %21 {strides = array<i32>} : memref<8x128xf32, #tpu.memory_space<vmem>>, vector<8x128xf32>,
      } else {
      }
    } else {
    }
    return
  }
  func.func @transform_0(%arg0: i32, %arg1: i32) -> (i32, i32) {
    %c0_i32 = arith.constant 0 : i32
    %c0_i32_0 = arith.constant 0 : i32
    %c0_i32_1 = arith.constant 0 : i32
    return %c0_i32, %c0_i32_0 : i32, i32
  }
  func.func @transform_1(%arg0: i32, %arg1: i32) -> (i32, i32) {
    %c0_i32 = arith.constant 0 : i32
    %c0_i32_0 = arith.constant 0 : i32
    %c0_i32_1 = arith.constant 0 : i32
    return %c0_i32, %c0_i32_0 : i32, i32
  }
  func.func @transform_2(%arg0: i32, %arg1: i32) -> (i32, i32) {
    %c1_i32 = arith.constant 1 : i32
    %0 = arith.muli %arg0, %c1_i32 : i32
    %1 = arith.addi %0, %arg1 : i32
    %c0_i32 = arith.constant 0 : i32
    %c0_i32_0 = arith.constant 0 : i32
    return %1, %c0_i32 : i32, i32
  }
  func.func @transform_3(%arg0: i32, %arg1: i32) -> (i32, i32) {
    %c1_i32 = arith.constant 1 : i32
    %0 = arith.muli %arg0, %c1_i32 : i32
    %1 = arith.addi %0, %arg1 : i32
    %c0_i32 = arith.constant 0 : i32
    %c0_i32_0 = arith.constant 0 : i32
    return %1, %c0_i32 : i32, i32
  }
  func.func @transform_4(%arg0: i32, %arg1: i32) -> (i32, i32) {
    %c0_i32 = arith.constant 0 : i32
    %c0_i32_0 = arith.constant 0 : i32
    return %arg0, %c0_i32 : i32, i32
  }
}

</mosaic_0001>

<bundles_post_ra>
// kernel: tpu_custom_call.1
= control target key start
LH: loop header
LB: loop body
LE: loop exit
PB: predicated region body
PF: predicated region fallthrough
CT: control target
= control target key end

     0   :  { %vm78_vm0 = vcmask 64512   ;;  %vm82_vm1 = vcmask 60416   ;;  %s248_s0 = inlined_call_operand.vmem [shape: f32[12,8], index: 0, kind: input, shape index: {}]   ;;  %s249_s1 = inlined_call_operand.vmem [shape: f32[12,8], index: 1, kind: input, shape index: {}]   ;;  %s250_s2 = inlined_call_operand.vmem [shape: f32[8,128], index: 2, kind: input, shape index: {}]   ;;  %s251_s3 = inlined_call_operand.vmem [shape: f32[8,128], index: 3, kind: input, shape index: {}]   ;;  %s252_s4 = inlined_call_operand.hbm [shape: f32[8,128], index: 4, kind: output, shape index: {}]  }
   0x1   :  { %v74_v0 = vld [vmem:[%s248_s0] sm:$0xff]  ;;  %v75_v1 = vld [vmem:[%s248_s0 + $0x8] sm:$0xf] }
   0x2   :  { %v79_v2 = vsel %vm78_vm0, %v74_v0, -inf }
   0x3   :  { %9 = vsyncpa [#allocation4], 0  ;;  %80 = vmax.xlane.f32.xlu0 %v79_v2  ;;  %v83_v3 = vsel %vm82_vm1, %v75_v1, -inf  ;;  %v76_v20 = vld [vmem:[%s249_s1] sm:$0xff]  ;;  %v77_v22 = vld [vmem:[%s249_s1 + $0x8] sm:$0xf]  ;;  %v120_v36 = vlaneseq }
   0x4   :  { %v57_v37 = vld [vmem:[%s250_s2] sm:$0xff]  ;;  %s195_s28 = smov [#allocation3]  }
   0x5   :  { %v58_v38 = vld [vmem:[%s251_s3] sm:$0xff]  ;;  %v121_v40 = vshrl.u32 %v120_v36, 7  ;;  %v123_v41 = vand.u32 127, %v120_v36  ;;  %s142_s29 = sshll.u32 %s195_s28, 4  ;;  %s143_s29 = int_to_ptr.vmem [resolvable:$true] %s142_s29 }
   0x6   :  { %v59_v39 = vsub.f32 %v57_v37, %v58_v38  ;;  %s173_s2 = scalar_lea.vmem %s143_s29, 128  ;;  %p178_p1 = scmp.lt.s32.totalorder %s143_s29, %s143_s29 }
   0x7   :  { %84 = vmax.xlane.f32.xlu0 %v83_v3  ;;  %vm124_vm2 = vcmp.eq.s32.totalorder %v121_v40, 0  ;;  %vm125_vm3 = vcmp.eq.s32.totalorder %v123_v41, 0  ;;  %p174_p0 = scmp.ne.s32.totalorder %s143_s29, %s173_s2  ;;  %p179_p2 = scmp.lt.s32.totalorder %s173_s2, %s173_s2 }
   0x8   :  { %v60_v42 = vmul.f32 %v59_v39, %v59_v39  ;;  %vm126_vm4 = vmand %vm124_vm2, %vm125_vm3 }
   0x9   :  { %p180_p3 = por %p179_p2, %p178_p1 }
   0xa   :  { %v69_v43 = vmul.f32 0.03125, %v60_v42 }
   0xb   :  { %p181_p4 = pnand %p180_p3, %p174_p0 }
  0x8c   :  { %v81_v4 = vpop.xlane.xlu0 %80 }
  0x8d   :  { %v86_v5 = vsub.f32 %v74_v0, %v81_v4 }
  0x8f   :  { %v88_v6 = vmul.f32 1.442695, %v86_v5 }
  0x90   :  { %v85_v7 = vpop.xlane.xlu0 %84 }
  0x91   :  { %165 = vpow2.f32 %v88_v6  ;;  %v87_v8 = vsub.f32 %v75_v1, %v85_v7 }
  0x93   :  { %v90_v9 = vmul.f32 1.442695, %v87_v8 }
  0x95   :  { %167 = vpow2.f32 %v90_v9 }
  0x9e   :  { %v166_v10 = vpop.eup %165 }
  0x9f   :  { %v92_v11 = vsel %vm78_vm0, %v166_v10, 0.0 }
  0xa0   :  { %93 = vadd.xlane.f32.xlu1 %v92_v11 }
  0xa2   :  { %v168_v12 = vpop.eup %167 }
  0xa3   :  { %v95_v13 = vsel %vm82_vm1, %v168_v12, 0.0 }
  0xa4   :  { %96 = vadd.xlane.f32.xlu1 %v95_v13 }
 0x129   :  { %v94_v14 = vpop.xlane.xlu1 %93 }
 0x12a   :  { %169 = vlog2.f32 %v94_v14 }
 0x12d   :  { %v97_v15 = vpop.xlane.xlu1 %96 }
 0x12e   :  { %171 = vlog2.f32 %v97_v15 }
 0x137   :  { %v170_v16 = vpop.eup %169 }
 0x138   :  { %v99_v17 = vmul.f32 0.6931472, %v170_v16 }
 0x13a   :  { %v102_v18 = vsub.f32 %v86_v5, %v99_v17 }
 0x13b   :  { %v172_v19 = vpop.eup %171 }
 0x13c   :  { %v101_v21 = vmul.f32 0.6931472, %v172_v19  ;;  %v104_v24 = vmul.f32 %v102_v18, %v76_v20 }
 0x13e   :  { %v103_v23 = vsub.f32 %v87_v8, %v101_v21  ;;  %v106_v26 = vsel %vm78_vm0, %v104_v24, 0.0 }
 0x140   :  { %v105_v25 = vmul.f32 %v103_v23, %v77_v22 }
 0x142   :  { %v107_v27 = vsel %vm82_vm1, %v105_v25, 0.0 }
 0x143   :  { %v108_v28 = vadd.f32 %v107_v27, %v106_v26 }
 0x145   :  { %109 = vadd.xlane.f32.xlu0 %v108_v28 }
 0x1ce   :  { %v110_v29 = vpop.xlane.xlu0 %109 }
 0x1cf   :  { %v111_v30 = vrot.slane %v110_v29, 4 }
 0x1d1   :  { %v112_v31 = vadd.f32 %v111_v30, %v110_v29 }
 0x1d3   :  { %v113_v32 = vrot.slane %v112_v31, 2 }
 0x1d5   :  { %v114_v33 = vadd.f32 %v113_v32, %v112_v31 }
 0x1d7   :  { %v115_v34 = vrot.slane %v114_v33, 1 }
 0x1d9   :  { %v116_v35 = vadd.f32 %v115_v34, %v114_v33 }
 0x1db   :  { %162 = vpush %v116_v35 }
 0x20c   :  { %s163_s25 = spop %162 }
 0x20d   :  { %s118_s26 = ssub.f32 0.0, %s163_s25 }
 0x20f   :  { %s119_s27 = smul.f32 0.083333336, %s118_s26 }
 0x211   :  { %v127_v44 = vstv %s119_s27 }
 0x212   :  { %v128_v45 = vsel %vm126_vm4, %v127_v44, 0.0 }
 0x213   :  { %v129_v46 = vadd.f32 %v128_v45, %v69_v43 }
 0x215   :  { %130 = vst [vmem:[#allocation3] sm:$0xff] %v129_v46 }
 0x216   :  { %184 = shalt.err (!%p181_p4)
}
 0x217   :  { %145 = dma.vmem_to_hbm [thread:$0]  %s143_s29, 128, %s252_s4, [#allocation4]  }
 0x218   :  { %193 = dma.done.wait [#allocation4], 128  }
 0x219   :  { %194 = vsyncadd [#allocation4], 4294967168 }
 0x21a   :  { %149 = vsyncpa [#allocation4], 1 }

</bundles_post_ra>
